<compile_context>
chip_gen: v5e
topology: v5e:2x2
jax: 0.10.0
libtpu: 0.0.40
codegen_flags: <defaults>
</compile_context>

<pallas_src>
import functools

import jax
import jax.numpy as jnp
from jax.experimental import pallas as pl
from jax.experimental.pallas import tpu as pltpu

HIDDEN = 64                       # per-head hidden width (from the nn.Module spec)
FUSED = 2 * HIDDEN                # 128: actor|critic hidden lanes == one vreg lane width
OUT_PAD = 128                     # lane-dense output slab width
OBS_PAD = 16                      # w1 block rows (>= obs_dim), bf16 (16,128)-tile aligned
BIAS_ROWS = 16                    # rows 0..2 hold b1,b2,b3 (16-row aligned)
W2_OFF = OBS_PAD                  # 16
W3_OFF = OBS_PAD + FUSED          # 144
B_OFF = OBS_PAD + 2 * FUSED       # 272
SLAB_ROWS = B_OFF + BIAS_ROWS     # 288
MAX_TILE_B = 1024                 # per-block batch cap (VMEM use stays << 64 MiB)


def fused_actor_critic_kernel(x_ref, p_ref, o_ref, *, obs_dim):
    """x_ref: (TB, obs_dim) f32; p_ref: (288, 128) bf16 packed params; o_ref: (TB, 128) f32."""
    x = x_ref[...].astype(jnp.bfloat16)                          # (TB, obs_dim)

    w1 = p_ref[0:obs_dim, :]                                     # (obs_dim, 128) bf16
    w2 = p_ref[W2_OFF:W2_OFF + FUSED, :]                         # (128, 128)  block-diag
    w3 = p_ref[W3_OFF:W3_OFF + FUSED, :]                         # (128, 128)
    b = p_ref[B_OFF:B_OFF + BIAS_ROWS, :].astype(jnp.float32)    # (16, 128) rows 0..2 used

    # bf16 MXU inputs, f32 accumulation; bias add + tanh in f32 (VPU/EUP).
    h = jnp.tanh(jnp.dot(x, w1, preferred_element_type=jnp.float32) + b[0:1, :])
    h = jnp.tanh(jnp.dot(h.astype(jnp.bfloat16), w2,
                         preferred_element_type=jnp.float32) + b[1:2, :])
    o_ref[...] = (jnp.dot(h.astype(jnp.bfloat16), w3,
                          preferred_element_type=jnp.float32) + b[2:3, :]).astype(o_ref.dtype)


def pack_params(params, obs_dim, act_dim, hidden=HIDDEN):
    """Pack the 12 Linear weights/biases into one (288, 128) bf16 slab.

    Weights are stored (in_features, out_features), i.e. already transposed
    relative to torch's nn.Linear, so the kernel computes y = x @ W + b.
    Actor occupies lanes [0:64] / output cols [0:act_dim];
    critic occupies lanes [64:128] / output col act_dim."""
    fused = 2 * hidden
    assert fused == FUSED == OUT_PAD, "hidden=64 per the module spec"
    assert obs_dim <= OBS_PAD, f"obs_dim={obs_dim} exceeds packed slab width {OBS_PAD}"
    assert act_dim + 1 <= OUT_PAD

    w1 = jnp.zeros((OBS_PAD, FUSED), jnp.float32)
    w1 = w1.at[:obs_dim, :hidden].set(params["aw1"])
    w1 = w1.at[:obs_dim, hidden:].set(params["cw1"])

    w2 = jnp.zeros((FUSED, FUSED), jnp.float32)
    w2 = w2.at[:hidden, :hidden].set(params["aw2"])
    w2 = w2.at[hidden:, hidden:].set(params["cw2"])

    w3 = jnp.zeros((FUSED, OUT_PAD), jnp.float32)
    w3 = w3.at[:hidden, :act_dim].set(params["aw3"])
    w3 = w3.at[hidden:, act_dim:act_dim + 1].set(params["cw3"])

    b = jnp.zeros((BIAS_ROWS, OUT_PAD), jnp.float32)
    b = b.at[0, :hidden].set(params["ab1"][0]).at[0, hidden:FUSED].set(params["cb1"][0])
    b = b.at[1, :hidden].set(params["ab2"][0]).at[1, hidden:FUSED].set(params["cb2"][0])
    b = b.at[2, :act_dim].set(params["ab3"][0]).at[2, act_dim:act_dim + 1].set(params["cb3"][0])

    return jnp.concatenate([w1, w2, w3, b], axis=0).astype(jnp.bfloat16)   # (288, 128)


def _cdiv(a, b):
    return -(-a // b)


def _round_up(a, m):
    return _cdiv(a, m) * m


def _num_tensorcores():
    """2 TensorCores per chip on v7x; 1 on v4/v5e/v6e."""
    try:
        kind = jax.devices()[0].device_kind.lower()
    except Exception:
        return 1
    return 2 if ("v7" in kind or "7x" in kind) else 1


def _choose_tile_b(batch, num_tc):
    if num_tc >= 2 and batch > 128:
        # At least 2 blocks so both TensorCores get work (megacore via "parallel").
        return min(_round_up(_cdiv(batch, num_tc), 8), MAX_TILE_B)
    if batch > MAX_TILE_B:
        return MAX_TILE_B
    # Single block: block dim == full array dim, so no (8,128) divisibility issue.
    return batch


def _call_kernel(x, param_slab, obs_dim, tile_b, grid_b, single_buffer_params):
    batch = x.shape[0]
    param_spec_kwargs = {}
    if single_buffer_params:
        # Constant index_map -> nothing to double-buffer; save the second 68 KiB buffer.
        param_spec_kwargs["pipeline_mode"] = pl.Buffered(1)
    return pl.pallas_call(
        functools.partial(fused_actor_critic_kernel, obs_dim=obs_dim),
        out_shape=jax.ShapeDtypeStruct((batch, OUT_PAD), jnp.float32),
        grid_spec=pltpu.PrefetchScalarGridSpec(
            num_scalar_prefetch=0,
            grid=(grid_b,),
            in_specs=[
                pl.BlockSpec((tile_b, obs_dim), lambda i: (i, 0)),
                # Same block every grid step -> weights stay resident in VMEM.
                pl.BlockSpec((SLAB_ROWS, OUT_PAD), lambda i: (0, 0), **param_spec_kwargs),
            ],
            out_specs=pl.BlockSpec((tile_b, OUT_PAD), lambda i: (i, 0)),
        ),
        compiler_params=pltpu.CompilerParams(dimension_semantics=("parallel",)),
    )(x, param_slab)


def actor_critic_forward(x, param_slab, act_dim):
    """x: (B, obs_dim) f32; param_slab: (288, 128) bf16 from pack_params.
    Returns (actor_out (B, act_dim), critic_out (B, 1)) == ActorCritic.forward(x)."""
    B, obs_dim = x.shape
    assert obs_dim <= OBS_PAD, f"obs_dim={obs_dim} exceeds packed slab width {OBS_PAD}"
    assert act_dim + 1 <= OUT_PAD
    x = x.astype(jnp.float32)

    tile_b = _choose_tile_b(B, _num_tensorcores())
    grid_b = _cdiv(B, tile_b)   # ragged last block is handled by Pallas (no batch padding)

    try:
        out = _call_kernel(x, param_slab, obs_dim, tile_b, grid_b, True)
    except Exception:
        # pl.Buffered(1) not supported on this jax version -> default double-buffering.
        out = _call_kernel(x, param_slab, obs_dim, tile_b, grid_b, False)

    actor_out = out[:, :act_dim]
    critic_out = out[:, act_dim:act_dim + 1]
    return actor_out, critic_out


def init_params(key, obs_dim, act_dim, hidden=HIDDEN):
    """Deterministic init (uniform, torch-default-Linear scale).
    Weights stored (in_features, out_features); biases stored (1, out_features)."""
    def linear(k, fan_in, fan_out):
        kw, kb = jax.random.split(k)
        bound = 1.0 / jnp.sqrt(jnp.float32(fan_in))
        w = jax.random.uniform(kw, (fan_in, fan_out), jnp.float32, -bound, bound)
        b = jax.random.uniform(kb, (1, fan_out), jnp.float32, -bound, bound)
        return w, b

    keys = jax.random.split(key, 6)
    aw1, ab1 = linear(keys[0], obs_dim, hidden)
    aw2, ab2 = linear(keys[1], hidden, hidden)
    aw3, ab3 = linear(keys[2], hidden, act_dim)
    cw1, cb1 = linear(keys[3], obs_dim, hidden)
    cw2, cb2 = linear(keys[4], hidden, hidden)
    cw3, cb3 = linear(keys[5], hidden, 1)
    # log_std is a free nn.Parameter, not used in forward(); kept for parity.
    log_std = jnp.zeros((act_dim,), jnp.float32)
    return dict(
        aw1=aw1, ab1=ab1, aw2=aw2, ab2=ab2, aw3=aw3, ab3=ab3,
        cw1=cw1, cb1=cb1, cw2=cw2, cb2=cb2, cw3=cw3, cb3=cb3,
        log_std=log_std,
    )


if __name__ == "__main__":
    # InvertedPendulum-v5: obs_dim = 4, act_dim = 1; 16 parallel envs -> B = 16.
    B, OBS_DIM, ACT_DIM = 16, 4, 1

    key = jax.random.PRNGKey(0)
    kx, kp = jax.random.split(key)
    x = jax.random.normal(kx, (B, OBS_DIM), jnp.float32)
    params = init_params(kp, OBS_DIM, ACT_DIM)

    # Pack once; in a real rollout loop this bf16 slab is reused every step.
    param_slab = pack_params(params, OBS_DIM, ACT_DIM)

    actor_out, critic_out = actor_critic_forward(x, param_slab, ACT_DIM)
    actor_out = jax.block_until_ready(actor_out)
    critic_out = jax.block_until_ready(critic_out)

    # Pure-JAX f32 reference (unfused, same math). bf16 weights -> relaxed tolerance.
    def mlp(xx, w1, b1, w2, b2, w3, b3):
        h = jnp.tanh(xx @ w1 + b1)
        h = jnp.tanh(h @ w2 + b2)
        return h @ w3 + b3

    ref_actor = mlp(x, params["aw1"], params["ab1"], params["aw2"],
                    params["ab2"], params["aw3"], params["ab3"])
    ref_critic = mlp(x, params["cw1"], params["cb1"], params["cw2"],
                     params["cb2"], params["cw3"], params["cb3"])

    assert actor_out.shape == (B, ACT_DIM) and critic_out.shape == (B, 1)
    assert bool(jnp.all(jnp.isfinite(actor_out))) and bool(jnp.all(jnp.isfinite(critic_out)))
    assert jnp.allclose(actor_out, ref_actor, atol=2e-2, rtol=2e-2)
    assert jnp.allclose(critic_out, ref_critic, atol=2e-2, rtol=2e-2)

    print("KERNEL_OK")
</pallas_src>

<mosaic_0001>
module attributes {stable_mosaic.version = 11 : i64} {
  func.func @fused_actor_critic_kernel(%arg0: i32, %arg1: memref<16x4xf32, #tpu.memory_space<vmem>>, %arg2: memref<288x128xbf16, #tpu.memory_space<vmem>>, %arg3: memref<16x128xf32, #tpu.memory_space<vmem>>) attributes {dimension_semantics = [#tpu.dimension_semantics<parallel>], iteration_bounds = array<i64: 1>, scalar_prefetch = 0 : i64, scratch_operands = 0 : i64, tpu.core_type = #tpu.core_type<tc>, window_params = [{transform_indices = @transform_0, window_bounds = array<i64: 16, 4>}, {pipeline_mode = #tpu.pipeline_mode<synchronous>, transform_indices = @transform_1, window_bounds = array<i64: 288, 128>}, {transform_indices = @transform_2, window_bounds = array<i64: 16, 128>}]} {
    %c0 = arith.constant 0 : index
    %c0_0 = arith.constant 0 : index
    %0 = vector.load %arg1[%c0, %c0_0] : memref<16x4xf32, #tpu.memory_space<vmem>>, vector<16x4xf32>
    %1 = arith.truncf %0 : vector<16x4xf32> to vector<16x4xbf16>
    %c0_1 = arith.constant 0 : index
    %c0_2 = arith.constant 0 : index
    %2 = vector.load %arg2[%c0_1, %c0_2] : memref<288x128xbf16, #tpu.memory_space<vmem>>, vector<4x128xbf16>
    %c16 = arith.constant 16 : index
    %c0_3 = arith.constant 0 : index
    %3 = vector.load %arg2[%c16, %c0_3] : memref<288x128xbf16, #tpu.memory_space<vmem>>, vector<128x128xbf16>
    %c144 = arith.constant 144 : index
    %c0_4 = arith.constant 0 : index
    %4 = vector.load %arg2[%c144, %c0_4] : memref<288x128xbf16, #tpu.memory_space<vmem>>, vector<128x128xbf16>
    %c272 = arith.constant 272 : index
    %c0_5 = arith.constant 0 : index
    %5 = vector.load %arg2[%c272, %c0_5] : memref<288x128xbf16, #tpu.memory_space<vmem>>, vector<16x128xbf16>
    %6 = arith.extf %5 : vector<16x128xbf16> to vector<16x128xf32>
    %cst = arith.constant dense<0.000000e+00> : vector<16x128xf32>
    %7 = tpu.matmul %1, %2, %cst {dimension_numbers = #tpu.dot_dimension_numbers<[1], [0], [0], [1], [0, 0, 1, 1], [], []>} : vector<16x4xbf16>, vector<4x128xbf16>, vector<16x128xf32> -> vector<16x128xf32>
    %8 = vector.extract_strided_slice %6 {offsets = [0, 0], sizes = [1, 128], strides = [1, 1]} : vector<16x128xf32> to vector<1x128xf32>
    %9 = vector.broadcast %8 : vector<1x128xf32> to vector<16x128xf32>
    %10 = arith.addf %7, %9 : vector<16x128xf32>
    %11 = math.tanh %10 : vector<16x128xf32>
    %12 = arith.truncf %11 : vector<16x128xf32> to vector<16x128xbf16>
    %cst_6 = arith.constant dense<0.000000e+00> : vector<16x128xf32>
    %13 = tpu.matmul %12, %3, %cst_6 {dimension_numbers = #tpu.dot_dimension_numbers<[1], [0], [0], [1], [0, 0, 1, 1], [], []>} : vector<16x128xbf16>, vector<128x128xbf16>, vector<16x128xf32> -> vector<16x128xf32>
    %14 = vector.extract_strided_slice %6 {offsets = [1, 0], sizes = [1, 128], strides = [1, 1]} : vector<16x128xf32> to vector<1x128xf32>
    %15 = vector.broadcast %14 : vector<1x128xf32> to vector<16x128xf32>
    %16 = arith.addf %13, %15 : vector<16x128xf32>
    %17 = math.tanh %16 : vector<16x128xf32>
    %18 = arith.truncf %17 : vector<16x128xf32> to vector<16x128xbf16>
    %cst_7 = arith.constant dense<0.000000e+00> : vector<16x128xf32>
    %19 = tpu.matmul %18, %4, %cst_7 {dimension_numbers = #tpu.dot_dimension_numbers<[1], [0], [0], [1], [0, 0, 1, 1], [], []>} : vector<16x128xbf16>, vector<128x128xbf16>, vector<16x128xf32> -> vector<16x128xf32>
    %20 = vector.extract_strided_slice %6 {offsets = [2, 0], sizes = [1, 128], strides = [1, 1]} : vector<16x128xf32> to vector<1x128xf32>
    %21 = vector.broadcast %20 : vector<1x128xf32> to vector<16x128xf32>
    %22 = arith.addf %19, %21 : vector<16x128xf32>
    %c0_8 = arith.constant 0 : index
    %c0_9 = arith.constant 0 : index
    %23 = vector.load %arg3[%c0_8, %c0_9] : memref<16x128xf32, #tpu.memory_space<vmem>>, vector<16x128xf32>
    tpu.vector_store %arg3[%c0_8, %c0_9], %22 {strides = array<i32>} : memref<16x128xf32, #tpu.memory_space<vmem>>, vector<16x128xf32>,
    return
  }
  func.func @transform_0(%arg0: i32) -> (i32, i32) {
    %c0_i32 = arith.constant 0 : i32
    %c0_i32_0 = arith.constant 0 : i32
    return %arg0, %c0_i32 : i32, i32
  }
  func.func @transform_1(%arg0: i32) -> (i32, i32) {
    %c0_i32 = arith.constant 0 : i32
    %c0_i32_0 = arith.constant 0 : i32
    %c0_i32_1 = arith.constant 0 : i32
    return %c0_i32, %c0_i32_0 : i32, i32
  }
  func.func @transform_2(%arg0: i32) -> (i32, i32) {
    %c0_i32 = arith.constant 0 : i32
    %c0_i32_0 = arith.constant 0 : i32
    return %arg0, %c0_i32 : i32, i32
  }
}

module attributes {stable_mosaic.version = 11 : i64} {
  func.func @fused_actor_critic_kernel(%arg0: i32, %arg1: memref<16x4xf32, #tpu.memory_space<vmem>>, %arg2: memref<288x128xbf16, #tpu.memory_space<vmem>>, %arg3: memref<16x128xf32, #tpu.memory_space<vmem>>) attributes {dimension_semantics = [#tpu.dimension_semantics<parallel>], iteration_bounds = array<i64: 1>, scalar_prefetch = 0 : i64, scratch_operands = 0 : i64, tpu.core_type = #tpu.core_type<tc>, window_params = [{transform_indices = @transform_0, window_bounds = array<i64: 16, 4>}, {pipeline_mode = #tpu.pipeline_mode<synchronous>, transform_indices = @transform_1, window_bounds = array<i64: 288, 128>}, {transform_indices = @transform_2, window_bounds = array<i64: 16, 128>}]} {
    %c0 = arith.constant 0 : index
    %c0_0 = arith.constant 0 : index
    %0 = vector.load %arg1[%c0, %c0_0] : memref<16x4xf32, #tpu.memory_space<vmem>>, vector<16x4xf32>
    %1 = arith.truncf %0 : vector<16x4xf32> to vector<16x4xbf16>
    %c0_1 = arith.constant 0 : index
    %c0_2 = arith.constant 0 : index
    %2 = vector.load %arg2[%c0_1, %c0_2] : memref<288x128xbf16, #tpu.memory_space<vmem>>, vector<4x128xbf16>
    %c16 = arith.constant 16 : index
    %c0_3 = arith.constant 0 : index
    %3 = vector.load %arg2[%c16, %c0_3] : memref<288x128xbf16, #tpu.memory_space<vmem>>, vector<128x128xbf16>
    %c144 = arith.constant 144 : index
    %c0_4 = arith.constant 0 : index
    %4 = vector.load %arg2[%c144, %c0_4] : memref<288x128xbf16, #tpu.memory_space<vmem>>, vector<128x128xbf16>
    %c272 = arith.constant 272 : index
    %c0_5 = arith.constant 0 : index
    %5 = vector.load %arg2[%c272, %c0_5] : memref<288x128xbf16, #tpu.memory_space<vmem>>, vector<16x128xbf16>
    %6 = arith.extf %5 : vector<16x128xbf16> to vector<16x128xf32>
    %cst = arith.constant dense<0.000000e+00> : vector<16x128xf32>
    %7 = tpu.matmul %1, %2, %cst {dimension_numbers = #tpu.dot_dimension_numbers<[1], [0], [0], [1], [0, 0, 1, 1], [], []>} : vector<16x4xbf16>, vector<4x128xbf16>, vector<16x128xf32> -> vector<16x128xf32>
    %8 = vector.extract_strided_slice %6 {offsets = [0, 0], sizes = [1, 128], strides = [1, 1]} : vector<16x128xf32> to vector<1x128xf32>
    %9 = vector.broadcast %8 : vector<1x128xf32> to vector<16x128xf32>
    %10 = arith.addf %7, %9 : vector<16x128xf32>
    %11 = math.tanh %10 : vector<16x128xf32>
    %12 = arith.truncf %11 : vector<16x128xf32> to vector<16x128xbf16>
    %cst_6 = arith.constant dense<0.000000e+00> : vector<16x128xf32>
    %13 = tpu.matmul %12, %3, %cst_6 {dimension_numbers = #tpu.dot_dimension_numbers<[1], [0], [0], [1], [0, 0, 1, 1], [], []>} : vector<16x128xbf16>, vector<128x128xbf16>, vector<16x128xf32> -> vector<16x128xf32>
    %14 = vector.extract_strided_slice %6 {offsets = [1, 0], sizes = [1, 128], strides = [1, 1]} : vector<16x128xf32> to vector<1x128xf32>
    %15 = vector.broadcast %14 : vector<1x128xf32> to vector<16x128xf32>
    %16 = arith.addf %13, %15 : vector<16x128xf32>
    %17 = math.tanh %16 : vector<16x128xf32>
    %18 = arith.truncf %17 : vector<16x128xf32> to vector<16x128xbf16>
    %cst_7 = arith.constant dense<0.000000e+00> : vector<16x128xf32>
    %19 = tpu.matmul %18, %4, %cst_7 {dimension_numbers = #tpu.dot_dimension_numbers<[1], [0], [0], [1], [0, 0, 1, 1], [], []>} : vector<16x128xbf16>, vector<128x128xbf16>, vector<16x128xf32> -> vector<16x128xf32>
    %20 = vector.extract_strided_slice %6 {offsets = [2, 0], sizes = [1, 128], strides = [1, 1]} : vector<16x128xf32> to vector<1x128xf32>
    %21 = vector.broadcast %20 : vector<1x128xf32> to vector<16x128xf32>
    %22 = arith.addf %19, %21 : vector<16x128xf32>
    %c0_8 = arith.constant 0 : index
    %c0_9 = arith.constant 0 : index
    %23 = vector.load %arg3[%c0_8, %c0_9] : memref<16x128xf32, #tpu.memory_space<vmem>>, vector<16x128xf32>
    tpu.vector_store %arg3[%c0_8, %c0_9], %22 {strides = array<i32>} : memref<16x128xf32, #tpu.memory_space<vmem>>, vector<16x128xf32>,
    return
  }
  func.func @transform_0(%arg0: i32) -> (i32, i32) {
    %c0_i32 = arith.constant 0 : i32
    %c0_i32_0 = arith.constant 0 : i32
    return %arg0, %c0_i32 : i32, i32
  }
  func.func @transform_1(%arg0: i32) -> (i32, i32) {
    %c0_i32 = arith.constant 0 : i32
    %c0_i32_0 = arith.constant 0 : i32
    %c0_i32_1 = arith.constant 0 : i32
    return %c0_i32, %c0_i32_0 : i32, i32
  }
  func.func @transform_2(%arg0: i32) -> (i32, i32) {
    %c0_i32 = arith.constant 0 : i32
    %c0_i32_0 = arith.constant 0 : i32
    return %arg0, %c0_i32 : i32, i32
  }
}

</mosaic_0001>

<bundles_post_ra>
// kernel: tpu_custom_call.1
= control target key start
LH: loop header
LB: loop body
LE: loop exit
PB: predicated region body
PF: predicated region fallthrough
CT: control target
= control target key end

     0   :  { %7 = vsyncpa [#allocation3], 0  ;;  %s423_s0 = inlined_call_operand.vmem [shape: f32[16,4], index: 0, kind: input, shape index: {}]   ;;  %s424_s1 = inlined_call_operand.hbm [shape: bf16[288,128], index: 1, kind: input, shape index: {}]   ;;  %s425_s2 = inlined_call_operand.hbm [shape: f32[16,128], index: 2, kind: output, shape index: {}]  }
   0x1   :  { %8 = vsyncpa [#allocation4], 0  ;;  %s15_s11 = sshll.u32 %s424_s1, 4  ;;  %s390_s12 = smov [#allocation2]   ;;  %s16_s11 = int_to_ptr.hbm [resolvable:$true] %s15_s11 }
   0x2   :  { %s17_s13 = sshll.u32 %s390_s12, 4  ;;  %s391_s14 = smov 64   ;;  %s18_s13 = int_to_ptr.vmem [resolvable:$true] %s17_s13 }
   0x3   :  { %s392_s15 = smov 4  }
   0x4   :  { %23 = dma.hbm_to_vmem [thread:$0]  %s16_s11, 2304, %s18_s13, [#allocation3], %s391_s14, %s391_s14, %s392_s15  }
   0x5   :  { %386 = dma.done.wait [#allocation3], 2304  }
   0x6   :  { %387 = vsyncadd [#allocation3], 4294964992  ;;  %vm72_vm0 = vcmask 1041408   ;;  %v32_v0 = vld [vmem:[#allocation2] sm:$0x3]  ;;  %v30_v2 = vld [vmem:[%s423_s0 + $0x8] sm:$0xff] }
   0x7   :  { %v29_v1 = vld [vmem:[%s423_s0] sm:$0xff]  ;;  %v74_v3 = vsel %vm72_vm0, %v32_v0, 0  ;;  %vm68_vm1 = vcmask 31744   ;;  %v314_v6 = vld [vmem:[#allocation2 + $0x38] sm:$0xff]  ;;  %v313_v7 = vld [vmem:[#allocation2 + $0x30] sm:$0xff]  ;;  %s393_s0 = smov [#allocation5]  }
   0x8   :  { %v31_v4 = vpack.c.bf16 %v30_v2, %v29_v1  ;;  %v315_v5 = vld [vmem:[#allocation2 + $0x40] sm:$0xff]  ;;  %83 = vmatpush.bf16.msra.mxu0 %v74_v3  ;;  %v312_v8 = vld [vmem:[#allocation2 + $0x28] sm:$0xff]  ;;  %v310_v10 = vld [vmem:[#allocation2 + $0x18] sm:$0xff]  ;;  %s228_s1 = sshll.u32 %s393_s0, 4  ;;  %s230_s22 = sshll.u32 %s425_s2, 4  ;;  %s229_s1 = int_to_ptr.vmem [resolvable:$true] %s228_s1  ;;  %s231_s22 = int_to_ptr.hbm [resolvable:$true] %s230_s22 }
   0x9   :  { %142 = vmatpush.bf16.msra.mxu1 %v315_v5  ;;  %v311_v9 = vld [vmem:[#allocation2 + $0x20] sm:$0xff]  ;;  %v309_v11 = vld [vmem:[#allocation2 + $0x10] sm:$0xff]  ;;  %v308_v12 = vld [vmem:[#allocation2 + $0x8] sm:$0xff]  ;;  %s394_s23 = smov 128   ;;  %s395_s24 = smov 8  }
   0xa   :  { %v323_v13 = vld [vmem:[#allocation2 + $0x80] sm:$0xff]  ;;  %v322_v14 = vld [vmem:[#allocation2 + $0x78] sm:$0xff]  ;;  %v321_v15 = vld [vmem:[#allocation2 + $0x70] sm:$0xff] }
   0xb   :  { %243 = vmatmul.msk.bf16.vlgmr.msra.gmra.mxu0 %vm68_vm1, %v31_v4  ;;  %208 = vmatpush.bf16.msra.mxu2 %v323_v13  ;;  %v65_v16 = vld [vmem:[#allocation2 + $0x88] sm:$0xf]  ;;  %v319_v27 = vld [vmem:[#allocation2 + $0x60] sm:$0xff]  ;;  %v318_v28 = vld [vmem:[#allocation2 + $0x58] sm:$0xff] }
   0xc   :  { %v66_v17 = vunpack.c.l.bf16 %v65_v16  ;;  %v320_v26 = vld [vmem:[#allocation2 + $0x68] sm:$0xff]  ;;  %v317_v29 = vld [vmem:[#allocation2 + $0x50] sm:$0xff] }
   0xd   :  { %143 = vmatpush.bf16.msra.mxu1 %v314_v6  ;;  %v316_v30 = vld [vmem:[#allocation2 + $0x48] sm:$0xff] }
   0xe   :  { %v67_v19 = vperm.slane %v66_v17, 0  ;;  %v93_v32 = vperm.slane %v66_v17, 1  ;;  %v159_v39 = vperm.slane %v66_v17, 2 }
   0xf   :  { %209 = vmatpush.bf16.msra.mxu2 %v322_v14 }
  0x11   :  { %144 = vmatpush.bf16.msra.mxu1 %v313_v7 }
  0x13   :  { %210 = vmatpush.bf16.msra.mxu2 %v321_v15 }
  0x15   :  { %145 = vmatpush.bf16.msra.mxu1 %v312_v8 }
  0x17   :  { %211 = vmatpush.bf16.msra.mxu2 %v320_v26 }
  0x19   :  { %146 = vmatpush.bf16.msra.mxu1 %v311_v9 }
  0x1b   :  { %212 = vmatpush.bf16.msra.mxu2 %v319_v27 }
  0x1d   :  { %147 = vmatpush.bf16.msra.mxu1 %v310_v10 }
  0x1f   :  { %213 = vmatpush.bf16.msra.mxu2 %v318_v28 }
  0x21   :  { %148 = vmatpush.bf16.msra.mxu1 %v309_v11 }
  0x23   :  { %214 = vmatpush.bf16.msra.mxu2 %v317_v29 }
  0x25   :  { %149 = vmatpush.bf16.msra.mxu1 %v308_v12 }
  0x27   :  { %215 = vmatpush.bf16.msra.mxu2 %v316_v30 }
  0x88   :  { %v85_v18 = vpop.f32.mrf.mxu0 }
  0x89   :  { %v86_v20 = vadd.f32 %v85_v18, %v67_v19 }
  0x8b   :  { %330 = vtanh.f32 %v86_v20 }
  0x90   :  { %v87_v21 = vpop.f32.mrf.mxu0 }
  0x91   :  { %v88_v22 = vadd.f32 %v87_v21, %v67_v19  ;;  %v331_v23 = vpop.eup %330 }
  0x93   :  { %332 = vtanh.f32 %v88_v22 }
  0x99   :  { %v333_v24 = vpop.eup %332 }
  0x9a   :  { %v92_v25 = vpack.c.bf16 %v333_v24, %v331_v23 }
  0x9c   :  { %150 = vmatmul.bf16.vlgmr.msra.gmra.mxu1 %v92_v25 }
 0x119   :  { %v151_v31 = vpop.f32.mrf.mxu1 }
 0x11a   :  { %v152_v33 = vadd.f32 %v151_v31, %v93_v32 }
 0x11c   :  { %334 = vtanh.f32 %v152_v33 }
 0x121   :  { %v153_v34 = vpop.f32.mrf.mxu1 }
 0x122   :  { %v154_v35 = vadd.f32 %v153_v34, %v93_v32  ;;  %v335_v36 = vpop.eup %334 }
 0x124   :  { %336 = vtanh.f32 %v154_v35 }
 0x12a   :  { %v337_v37 = vpop.eup %336 }
 0x12b   :  { %v158_v38 = vpack.c.bf16 %v337_v37, %v335_v36 }
 0x12d   :  { %216 = vmatmul.bf16.vlgmr.msra.gmra.mxu2 %v158_v38 }
 0x1b0   :  { %v217_v40 = vpop.f32.mrf.mxu2 }
 0x1b1   :  { %v218_v41 = vadd.f32 %v217_v40, %v159_v39 }
 0x1b3   :  { %222 = vst [vmem:[#allocation5] sm:$0xff] %v218_v41 }
 0x1b8   :  { %v219_v42 = vpop.f32.mrf.mxu2 }
 0x1b9   :  { %v220_v43 = vadd.f32 %v219_v42, %v159_v39 }
 0x1bb   :  { %223 = vst [vmem:[#allocation5 + $0x8] sm:$0xff] %v220_v43 }
 0x1bc   :  { %236 = dma.vmem_to_hbm [thread:$0]  %s229_s1, 256, %s231_s22, [#allocation4], %s394_s23, %s394_s23, %s395_s24  }
 0x1bd   :  { %388 = dma.done.wait [#allocation4], 256  }
 0x1be   :  { %389 = vsyncadd [#allocation4], 4294967040 }
 0x1bf   :  { %241 = vsyncpa [#allocation3], 1 }
 0x1c0   :  { %242 = vsyncpa [#allocation4], 1 }

// kernel: tpu_custom_call.1
= control target key start
LH: loop header
LB: loop body
LE: loop exit
PB: predicated region body
PF: predicated region fallthrough
CT: control target
= control target key end

     0   :  { %7 = vsyncpa [#allocation3], 0  ;;  %s423_s0 = inlined_call_operand.vmem [shape: f32[16,4], index: 0, kind: input, shape index: {}]   ;;  %s424_s1 = inlined_call_operand.hbm [shape: bf16[288,128], index: 1, kind: input, shape index: {}]   ;;  %s425_s2 = inlined_call_operand.hbm [shape: f32[16,128], index: 2, kind: output, shape index: {}]  }
   0x1   :  { %8 = vsyncpa [#allocation4], 0  ;;  %s15_s11 = sshll.u32 %s424_s1, 4  ;;  %s390_s12 = smov [#allocation2]   ;;  %s16_s11 = int_to_ptr.hbm [resolvable:$true] %s15_s11 }
   0x2   :  { %s17_s13 = sshll.u32 %s390_s12, 4  ;;  %s391_s14 = smov 64   ;;  %s18_s13 = int_to_ptr.vmem [resolvable:$true] %s17_s13 }
   0x3   :  { %s392_s15 = smov 4  }
   0x4   :  { %23 = dma.hbm_to_vmem [thread:$0]  %s16_s11, 2304, %s18_s13, [#allocation3], %s391_s14, %s391_s14, %s392_s15  }
   0x5   :  { %386 = dma.done.wait [#allocation3], 2304  }
   0x6   :  { %387 = vsyncadd [#allocation3], 4294964992  ;;  %vm72_vm0 = vcmask 1041408   ;;  %v32_v0 = vld [vmem:[#allocation2] sm:$0x3]  ;;  %v30_v2 = vld [vmem:[%s423_s0 + $0x8] sm:$0xff] }
   0x7   :  { %v29_v1 = vld [vmem:[%s423_s0] sm:$0xff]  ;;  %v74_v3 = vsel %vm72_vm0, %v32_v0, 0  ;;  %vm68_vm1 = vcmask 31744   ;;  %v314_v6 = vld [vmem:[#allocation2 + $0x38] sm:$0xff]  ;;  %v313_v7 = vld [vmem:[#allocation2 + $0x30] sm:$0xff]  ;;  %s393_s0 = smov [#allocation5]  }
   0x8   :  { %v31_v4 = vpack.c.bf16 %v30_v2, %v29_v1  ;;  %v315_v5 = vld [vmem:[#allocation2 + $0x40] sm:$0xff]  ;;  %83 = vmatpush.bf16.msra.mxu0 %v74_v3  ;;  %v312_v8 = vld [vmem:[#allocation2 + $0x28] sm:$0xff]  ;;  %v310_v10 = vld [vmem:[#allocation2 + $0x18] sm:$0xff]  ;;  %s228_s1 = sshll.u32 %s393_s0, 4  ;;  %s230_s22 = sshll.u32 %s425_s2, 4  ;;  %s229_s1 = int_to_ptr.vmem [resolvable:$true] %s228_s1  ;;  %s231_s22 = int_to_ptr.hbm [resolvable:$true] %s230_s22 }
   0x9   :  { %142 = vmatpush.bf16.msra.mxu1 %v315_v5  ;;  %v311_v9 = vld [vmem:[#allocation2 + $0x20] sm:$0xff]  ;;  %v309_v11 = vld [vmem:[#allocation2 + $0x10] sm:$0xff]  ;;  %v308_v12 = vld [vmem:[#allocation2 + $0x8] sm:$0xff]  ;;  %s394_s23 = smov 128   ;;  %s395_s24 = smov 8  }
   0xa   :  { %v323_v13 = vld [vmem:[#allocation2 + $0x80] sm:$0xff]  ;;  %v322_v14 = vld [vmem:[#allocation2 + $0x78] sm:$0xff]  ;;  %v321_v15 = vld [vmem:[#allocation2 + $0x70] sm:$0xff] }
   0xb   :  { %243 = vmatmul.msk.bf16.vlgmr.msra.gmra.mxu0 %vm68_vm1, %v31_v4  ;;  %208 = vmatpush.bf16.msra.mxu2 %v323_v13  ;;  %v65_v16 = vld [vmem:[#allocation2 + $0x88] sm:$0xf]  ;;  %v319_v27 = vld [vmem:[#allocation2 + $0x60] sm:$0xff]  ;;  %v318_v28 = vld [vmem:[#allocation2 + $0x58] sm:$0xff] }
   0xc   :  { %v66_v17 = vunpack.c.l.bf16 %v65_v16  ;;  %v320_v26 = vld [vmem:[#allocation2 + $0x68] sm:$0xff]  ;;  %v317_v29 = vld [vmem:[#allocation2 + $0x50] sm:$0xff] }
   0xd   :  { %143 = vmatpush.bf16.msra.mxu1 %v314_v6  ;;  %v316_v30 = vld [vmem:[#allocation2 + $0x48] sm:$0xff] }
   0xe   :  { %v67_v19 = vperm.slane %v66_v17, 0  ;;  %v93_v32 = vperm.slane %v66_v17, 1  ;;  %v159_v39 = vperm.slane %v66_v17, 2 }
   0xf   :  { %209 = vmatpush.bf16.msra.mxu2 %v322_v14 }
  0x11   :  { %144 = vmatpush.bf16.msra.mxu1 %v313_v7 }
  0x13   :  { %210 = vmatpush.bf16.msra.mxu2 %v321_v15 }
  0x15   :  { %145 = vmatpush.bf16.msra.mxu1 %v312_v8 }
  0x17   :  { %211 = vmatpush.bf16.msra.mxu2 %v320_v26 }
  0x19   :  { %146 = vmatpush.bf16.msra.mxu1 %v311_v9 }
  0x1b   :  { %212 = vmatpush.bf16.msra.mxu2 %v319_v27 }
  0x1d   :  { %147 = vmatpush.bf16.msra.mxu1 %v310_v10 }
  0x1f   :  { %213 = vmatpush.bf16.msra.mxu2 %v318_v28 }
  0x21   :  { %148 = vmatpush.bf16.msra.mxu1 %v309_v11 }
  0x23   :  { %214 = vmatpush.bf16.msra.mxu2 %v317_v29 }
  0x25   :  { %149 = vmatpush.bf16.msra.mxu1 %v308_v12 }
  0x27   :  { %215 = vmatpush.bf16.msra.mxu2 %v316_v30 }
  0x88   :  { %v85_v18 = vpop.f32.mrf.mxu0 }
  0x89   :  { %v86_v20 = vadd.f32 %v85_v18, %v67_v19 }
  0x8b   :  { %330 = vtanh.f32 %v86_v20 }
  0x90   :  { %v87_v21 = vpop.f32.mrf.mxu0 }
  0x91   :  { %v88_v22 = vadd.f32 %v87_v21, %v67_v19  ;;  %v331_v23 = vpop.eup %330 }
  0x93   :  { %332 = vtanh.f32 %v88_v22 }
  0x99   :  { %v333_v24 = vpop.eup %332 }
  0x9a   :  { %v92_v25 = vpack.c.bf16 %v333_v24, %v331_v23 }
  0x9c   :  { %150 = vmatmul.bf16.vlgmr.msra.gmra.mxu1 %v92_v25 }
 0x119   :  { %v151_v31 = vpop.f32.mrf.mxu1 }
 0x11a   :  { %v152_v33 = vadd.f32 %v151_v31, %v93_v32 }
 0x11c   :  { %334 = vtanh.f32 %v152_v33 }
 0x121   :  { %v153_v34 = vpop.f32.mrf.mxu1 }
 0x122   :  { %v154_v35 = vadd.f32 %v153_v34, %v93_v32  ;;  %v335_v36 = vpop.eup %334 }
 0x124   :  { %336 = vtanh.f32 %v154_v35 }
 0x12a   :  { %v337_v37 = vpop.eup %336 }
 0x12b   :  { %v158_v38 = vpack.c.bf16 %v337_v37, %v335_v36 }
 0x12d   :  { %216 = vmatmul.bf16.vlgmr.msra.gmra.mxu2 %v158_v38 }
 0x1b0   :  { %v217_v40 = vpop.f32.mrf.mxu2 }
 0x1b1   :  { %v218_v41 = vadd.f32 %v217_v40, %v159_v39 }
 0x1b3   :  { %222 = vst [vmem:[#allocation5] sm:$0xff] %v218_v41 }
 0x1b8   :  { %v219_v42 = vpop.f32.mrf.mxu2 }
 0x1b9   :  { %v220_v43 = vadd.f32 %v219_v42, %v159_v39 }
 0x1bb   :  { %223 = vst [vmem:[#allocation5 + $0x8] sm:$0xff] %v220_v43 }
 0x1bc   :  { %236 = dma.vmem_to_hbm [thread:$0]  %s229_s1, 256, %s231_s22, [#allocation4], %s394_s23, %s394_s23, %s395_s24  }
 0x1bd   :  { %388 = dma.done.wait [#allocation4], 256  }
 0x1be   :  { %389 = vsyncadd [#allocation4], 4294967040 }
 0x1bf   :  { %241 = vsyncpa [#allocation3], 1 }
 0x1c0   :  { %242 = vsyncpa [#allocation4], 1 }

</bundles_post_ra>
